<compile_context>
chip_gen: v5e
topology: v5e:2x2
jax: 0.10.0
libtpu: 0.0.40
codegen_flags: <defaults>
</compile_context>

<pallas_src>
import functools
import math

import jax
import jax.numpy as jnp
from jax.experimental import pallas as pl
from jax.experimental.pallas import tpu as pltpu


def _linear_loc_kernel(x_ref, w_ref, off_ref, o_ref, *, compute_dtype):
    # Fused elementwise on the VPU: out = offset + weight * x.
    # Operand blocks are (tr,tc), (tr,1), (1,tc) or (1,1); jnp broadcasting
    # handles the lane/sublane broadcast in-register.
    x = x_ref[...].astype(compute_dtype)
    w = w_ref[...].astype(compute_dtype)
    b = off_ref[...].astype(compute_dtype)
    o_ref[...] = (b + w * x).astype(o_ref.dtype)


def _classify(p_sh, split):
    row_is1 = all(d == 1 for d in p_sh[:split])
    col_is1 = all(d == 1 for d in p_sh[split:])
    if row_is1 and col_is1:
        return "scalar"
    if col_is1:
        return "row"
    if row_is1:
        return "col"
    return "full"


def _repr_elems(kind, rows, cols):
    return {"scalar": 1, "row": rows, "col": cols, "full": rows * cols}[kind]


def _round_up(n, m):
    return ((n + m - 1) // m) * m


def _padded_vmem_bytes(r, c, itemsize):
    # VMEM layout pads the last dim to 128 lanes and the 2nd-to-last to 8 sublanes.
    return _round_up(max(r, 1), 8) * _round_up(max(c, 1), 128) * itemsize


def linear_location(x, weight, offset, *, target_block_bytes=2 << 20,
                    donate_x=False):
    """offset + weight * x with PyTorch-style broadcasting, computed in Pallas."""
    x = jnp.asarray(x)
    w = jnp.asarray(weight)
    off = jnp.asarray(offset)

    out_shape = jnp.broadcast_shapes(x.shape, w.shape, off.shape)
    out_dtype = jnp.result_type(x.dtype, w.dtype, off.dtype)
    ndim = len(out_shape)
    total = math.prod(out_shape) if out_shape else 1

    if total == 0:
        return jnp.zeros(out_shape, out_dtype)

    def _aligned(shape):
        return (1,) * (ndim - len(shape)) + tuple(shape)

    x_sh, w_sh, off_sh = _aligned(x.shape), _aligned(w.shape), _aligned(off.shape)

    # ---- choose the row/col split: lane-dense output, thinnest operands ----
    best = None
    for s in range(ndim + 1):
        cols_s = math.prod(out_shape[s:]) if s < ndim else 1
        rows_s = total // cols_s
        kinds = tuple(_classify(p, s) for p in (x_sh, w_sh, off_sh))
        traffic = sum(_repr_elems(k, rows_s, cols_s) for k in kinds)
        very_narrow = cols_s < min(16, total)    # catastrophic lane utilization
        narrow = cols_s < min(128, total)        # masked partial-lane stores
        score = (very_narrow, traffic, narrow, -s)
        if best is None or score < best[0]:
            best = (score, s, cols_s, rows_s, kinds)
    _, split, cols, rows, (x_kind, w_kind, off_kind) = best

    # ---- block sizing -------------------------------------------------------
    x_item = jnp.dtype(x.dtype).itemsize
    out_item = jnp.dtype(out_dtype).itemsize
    per_elem = x_item + out_item

    MAX_TC = 8192  # lane tile (multiple of 128) when the lane axis is huge
    tc = cols if cols <= MAX_TC else MAX_TC
    target_rows = max(1, target_block_bytes // max(1, tc * per_elem))
    if rows <= 8:
        tr = rows
    else:
        tr = min(rows, max(8, (target_rows // 8) * 8))

    # Guarantee enough grid steps that the DMA pipeline overlaps and (on v7x)
    # both TensorCores stream data; never leave a multi-MiB problem on 1 step.
    total_bytes = total * per_elem
    if total_bytes >= (4 << 20):
        min_steps = 8
    elif total_bytes >= (256 << 10):
        min_steps = 2
    else:
        min_steps = 1

    while pl.cdiv(rows, tr) * pl.cdiv(cols, tc) < min_steps:
        if tr > 8:
            tr = max(8, _round_up(tr // 2, 8))
        elif tc > 256:
            tc = max(128, _round_up(pl.cdiv(tc, 2), 128))
        else:
            break

    # ---- materialize thin 2-D operand representations ----------------------
    def _materialize(p, p_sh, kind):
        p = p.reshape(p_sh)
        if kind == "scalar":
            return p.reshape(1, 1)
        if kind == "row":
            tgt = out_shape[:split] + (1,) * (ndim - split)
            return jnp.broadcast_to(p, tgt).reshape(rows, 1)
        if kind == "col":
            tgt = (1,) * split + out_shape[split:]
            return jnp.broadcast_to(p, tgt).reshape(1, cols)
        # 'full': broadcast_to is a no-op when p already has the output shape
        # (the common case for x), so no extra HBM pass and no dtype cast here.
        return jnp.broadcast_to(p, out_shape).reshape(rows, cols)

    x2 = _materialize(x, x_sh, x_kind)
    w2 = _materialize(w, w_sh, w_kind)
    off2 = _materialize(off, off_sh, off_kind)

    # ---- BlockSpecs ---------------------------------------------------------
    RESIDENT_VMEM = 1 << 20  # small side operands stay resident across the grid

    def _operand_spec(arr, kind):
        itemsize = arr.dtype.itemsize
        if kind == "scalar":
            return pl.BlockSpec((1, 1), lambda i, j: (0, 0)), (1, 1)
        if kind == "row":
            if _padded_vmem_bytes(rows, 1, itemsize) <= RESIDENT_VMEM:
                return pl.BlockSpec((rows, 1), lambda i, j: (0, 0)), (rows, 1)
            return pl.BlockSpec((tr, 1), lambda i, j: (i, 0)), (tr, 1)
        if kind == "col":
            if _padded_vmem_bytes(1, cols, itemsize) <= RESIDENT_VMEM:
                return pl.BlockSpec((1, cols), lambda i, j: (0, 0)), (1, cols)
            return pl.BlockSpec((1, tc), lambda i, j: (0, j)), (1, tc)
        return pl.BlockSpec((tr, tc), lambda i, j: (i, j)), (tr, tc)

    specs_blocks = [_operand_spec(a, k) for a, k in
                    ((x2, x_kind), (w2, w_kind), (off2, off_kind))]
    in_specs = [s for s, _ in specs_blocks]
    out_spec = pl.BlockSpec((tr, tc), lambda i, j: (i, j))
    grid = (pl.cdiv(rows, tr), pl.cdiv(cols, tc))

    # ---- compiler params / VMEM budget -------------------------------------
    vmem_needed = 2 * _padded_vmem_bytes(tr, tc, out_item)
    for (_, blk), arr in zip(specs_blocks, (x2, w2, off2)):
        vmem_needed += 2 * _padded_vmem_bytes(blk[0], blk[1], arr.dtype.itemsize)

    compiler_kwargs = dict(dimension_semantics=("parallel", "parallel"))
    if vmem_needed > (14 << 20):
        # Default scoped VMEM: 16 MiB (v5e) / 32 MiB (v6e, v7x). Raise it with
        # slack when needed, staying well below v7x's 64 MiB physical VMEM.
        compiler_kwargs["vmem_limit_bytes"] = min(
            int(vmem_needed * 1.25) + (2 << 20), 48 << 20)

    if jnp.issubdtype(out_dtype, jnp.floating):
        compute_dtype = jnp.promote_types(out_dtype, jnp.float32)
    else:
        compute_dtype = out_dtype

    bytes_accessed = (x2.size * x2.dtype.itemsize
                      + w2.size * w2.dtype.itemsize
                      + off2.size * off2.dtype.itemsize
                      + total * out_item)
    cost = pl.CostEstimate(flops=2 * total, transcendentals=0,
                           bytes_accessed=bytes_accessed)

    io_aliases = {}
    if donate_x and x_kind == "full" and x2.dtype == out_dtype:
        io_aliases = {0: 0}   # reuse x's buffer for the output (caller donates x)

    out2 = pl.pallas_call(
        functools.partial(_linear_loc_kernel, compute_dtype=compute_dtype),
        out_shape=jax.ShapeDtypeStruct((rows, cols), out_dtype),
        grid_spec=pltpu.PrefetchScalarGridSpec(
            num_scalar_prefetch=0,
            grid=grid,
            in_specs=in_specs,
            out_specs=out_spec,
        ),
        compiler_params=pltpu.CompilerParams(**compiler_kwargs),
        cost_estimate=cost,
        input_output_aliases=io_aliases,
    )(x2, w2, off2)

    return out2.reshape(out_shape)


if __name__ == "__main__":
    key = jax.random.PRNGKey(0)
    kx, kw, ko = jax.random.split(key, 3)

    # 1) NCHW input, per-channel weight/offset (broadcast like PyTorch).
    B, C, H, W = 2, 4, 16, 16
    x = jax.random.normal(kx, (B, C, H, W), dtype=jnp.float32)
    weight = jax.random.normal(kw, (C, 1, 1), dtype=jnp.float32)
    offset = jax.random.normal(ko, (C, 1, 1), dtype=jnp.float32)

    y = jax.block_until_ready(linear_location(x, weight, offset))
    y_ref = offset + weight * x
    assert y.shape == y_ref.shape, (y.shape, y_ref.shape)
    assert jnp.allclose(y, y_ref, atol=1e-6, rtol=1e-6), "per-channel mismatch"

    # 2) Scalar weight/offset.
    y2 = jax.block_until_ready(linear_location(x, 1.5, -0.25))
    assert jnp.allclose(y2, -0.25 + 1.5 * x, atol=1e-6, rtol=1e-6), "scalar mismatch"

    # 3) Mixed dtype: bf16 activations, f32 params (no wrapper-side cast pass).
    x_bf16 = x.astype(jnp.bfloat16)
    y3 = jax.block_until_ready(linear_location(x_bf16, weight, offset))
    y3_ref = offset + weight * x_bf16
    assert y3.dtype == y3_ref.dtype
    assert jnp.allclose(y3, y3_ref, atol=1e-5, rtol=1e-5), "mixed-dtype mismatch"

    # 4) Params varying along the last (feature) dim -> thin (1, cols) stream.
    D = 256
    xf = jax.random.normal(kx, (2, 8, D), dtype=jnp.float32)
    wf = jax.random.normal(kw, (D,), dtype=jnp.float32)
    of = jax.random.normal(ko, (D,), dtype=jnp.float32)
    y4 = jax.block_until_ready(linear_location(xf, wf, of))
    assert jnp.allclose(y4, of + wf * xf, atol=1e-6, rtol=1e-6), "lastdim mismatch"

    print("KERNEL_OK")
</pallas_src>

<mosaic_0001>
module attributes {stable_mosaic.version = 11 : i64} {
  func.func @_linear_loc_kernel(%arg0: i32, %arg1: i32, %arg2: memref<8x256xf32, #tpu.memory_space<vmem>>, %arg3: memref<8x1xf32, #tpu.memory_space<vmem>>, %arg4: memref<8x1xf32, #tpu.memory_space<vmem>>, %arg5: memref<8x256xf32, #tpu.memory_space<vmem>>) attributes {dimension_semantics = [#tpu.dimension_semantics<parallel>, #tpu.dimension_semantics<parallel>], iteration_bounds = array<i64: 1, 1>, scalar_prefetch = 0 : i64, scratch_operands = 0 : i64, tpu.core_type = #tpu.core_type<tc>, window_params = [{transform_indices = @transform_0, window_bounds = array<i64: 8, 256>}, {pipeline_mode = #tpu.pipeline_mode<synchronous>, transform_indices = @transform_1, window_bounds = array<i64: 8, 1>}, {pipeline_mode = #tpu.pipeline_mode<synchronous>, transform_indices = @transform_2, window_bounds = array<i64: 8, 1>}, {transform_indices = @transform_3, window_bounds = array<i64: 8, 256>}]} {
    %c0 = arith.constant 0 : index
    %c0_0 = arith.constant 0 : index
    %0 = vector.load %arg2[%c0, %c0_0] : memref<8x256xf32, #tpu.memory_space<vmem>>, vector<8x256xf32>
    %c0_1 = arith.constant 0 : index
    %c0_2 = arith.constant 0 : index
    %1 = vector.load %arg3[%c0_1, %c0_2] : memref<8x1xf32, #tpu.memory_space<vmem>>, vector<8x1xf32>
    %c0_3 = arith.constant 0 : index
    %c0_4 = arith.constant 0 : index
    %2 = vector.load %arg4[%c0_3, %c0_4] : memref<8x1xf32, #tpu.memory_space<vmem>>, vector<8x1xf32>
    %3 = vector.broadcast %1 : vector<8x1xf32> to vector<8x256xf32>
    %4 = arith.mulf %3, %0 : vector<8x256xf32>
    %5 = vector.broadcast %2 : vector<8x1xf32> to vector<8x256xf32>
    %6 = arith.addf %5, %4 : vector<8x256xf32>
    %c0_5 = arith.constant 0 : index
    %c0_6 = arith.constant 0 : index
    %7 = vector.load %arg5[%c0_5, %c0_6] : memref<8x256xf32, #tpu.memory_space<vmem>>, vector<8x256xf32>
    tpu.vector_store %arg5[%c0_5, %c0_6], %6 {strides = array<i32>} : memref<8x256xf32, #tpu.memory_space<vmem>>, vector<8x256xf32>,
    return
  }
  func.func @transform_0(%arg0: i32, %arg1: i32) -> (i32, i32) {
    %c0_i32 = arith.constant 0 : i32
    return %arg0, %arg1 : i32, i32
  }
  func.func @transform_1(%arg0: i32, %arg1: i32) -> (i32, i32) {
    %c0_i32 = arith.constant 0 : i32
    %c0_i32_0 = arith.constant 0 : i32
    %c0_i32_1 = arith.constant 0 : i32
    return %c0_i32, %c0_i32_0 : i32, i32
  }
  func.func @transform_2(%arg0: i32, %arg1: i32) -> (i32, i32) {
    %c0_i32 = arith.constant 0 : i32
    %c0_i32_0 = arith.constant 0 : i32
    %c0_i32_1 = arith.constant 0 : i32
    return %c0_i32, %c0_i32_0 : i32, i32
  }
  func.func @transform_3(%arg0: i32, %arg1: i32) -> (i32, i32) {
    %c0_i32 = arith.constant 0 : i32
    return %arg0, %arg1 : i32, i32
  }
}

</mosaic_0001>

<bundles_post_ra>
// kernel: tpu_custom_call.1
= control target key start
LH: loop header
LB: loop body
LE: loop exit
PB: predicated region body
PF: predicated region fallthrough
CT: control target
= control target key end

     0   :  { %s117_s0 = inlined_call_operand.vmem [shape: f32[8,256], index: 0, kind: input, shape index: {}]   ;;  %s118_s1 = inlined_call_operand.vmem [shape: f32[8,1], index: 1, kind: input, shape index: {}]   ;;  %s119_s2 = inlined_call_operand.vmem [shape: f32[8,1], index: 2, kind: input, shape index: {}]   ;;  %s120_s3 = inlined_call_operand.hbm [shape: f32[8,256], index: 3, kind: output, shape index: {}]  }
   0x1   :  { %v17_v0 = vld [vmem:[%s118_s1] sm:$0xff] }
   0x2   :  { %8 = vsyncpa [#allocation3], 0  ;;  %v80_v1 = vmov 0   ;;  %v18_v2 = vld [vmem:[%s119_s2] sm:$0xff]  ;;  %v16_v5 = vld [vmem:[%s117_s0 + $0x8] sm:$0xff]  ;;  %s81_s1 = smov [#allocation2]  }
   0x3   :  { %53 = vset.pattern.permute.xlu0 %v80_v1  ;;  %v15_v4 = vld [vmem:[%s117_s0] sm:$0xff]  ;;  %s40_s20 = sshll.u32 %s81_s1, 4  ;;  %s42_s23 = sshll.u32 %s120_s3, 4  ;;  %s41_s20 = int_to_ptr.vmem [resolvable:$true] %s40_s20  ;;  %s43_s23 = int_to_ptr.hbm [resolvable:$true] %s42_s23 }
   0x4   :  { %21 = vperm.xlu0 %53, %v17_v0  }
   0xc   :  { %28 = vperm.xlu0 %53, %v18_v2  }
  0x76   :  { %v22_v3 = vpop.permute.xlu0 %21 }
  0x77   :  { %v24_v6 = vmul.f32 %v22_v3, %v15_v4  ;;  %v25_v7 = vmul.f32 %v22_v3, %v16_v5 }
  0x7e   :  { %v29_v8 = vpop.permute.xlu0 %28 }
  0x7f   :  { %v31_v9 = vadd.f32 %v29_v8, %v24_v6  ;;  %v32_v10 = vadd.f32 %v29_v8, %v25_v7 }
  0x81   :  { %33 = vst [vmem:[#allocation2] sm:$0xff] %v31_v9 }
  0x82   :  { %34 = vst [vmem:[#allocation2 + $0x8] sm:$0xff] %v32_v10 }
  0x83   :  { %45 = dma.vmem_to_hbm [thread:$0]  %s41_s20, 256, %s43_s23, [#allocation3]  }
  0x84   :  { %78 = dma.done.wait [#allocation3], 256  }
  0x85   :  { %79 = vsyncadd [#allocation3], 4294967040 }
  0x86   :  { %50 = vsyncpa [#allocation3], 1 }

</bundles_post_ra>
